<compile_context>
chip_gen: v5e
topology: v5e:2x2
jax: 0.10.0
libtpu: 0.0.40
codegen_flags: <defaults>
</compile_context>

<pallas_src>
import functools

import jax
import jax.numpy as jnp
from jax.experimental import pallas as pl
from jax.experimental.pallas import tpu as pltpu

BN_EPS = 1e-5   # PyTorch BatchNorm1d default eps
LANE = 128      # TPU lane width


def classifier_head_kernel(ids_ref, table_hbm, w1_ref, params_ref, w2_ref,
                           out_ref, emb_buf, sem, *, hp, op, batch):
    # ---- fused CLS pooling: gather the B CLS-token embedding rows straight
    # from the table in HBM (ids live in SMEM via scalar prefetch).
    copies = []
    for b in range(batch):
        tok = ids_ref[b]                                   # scalar read (SMEM)
        cp = pltpu.make_async_copy(table_hbm.at[pl.ds(tok, 1), :],
                                   emb_buf.at[pl.ds(b, 1), :],
                                   sem.at[b])
        cp.start()
        copies.append(cp)
    for cp in copies:                                      # waits after all scalar reads
        cp.wait()

    emb = emb_buf[...]                                     # (B, F) f32; dropout(p=0) = id

    params = params_ref[...]                               # (3, P) f32, one packed DMA
    gamma = params[0:1, :hp]                               # (1, Hp)
    beta = params[1:2, :hp]                                # (1, Hp)
    b2 = params[2:3, :op]                                  # (1, Op)

    # fc1: single native bf16 MXU pass, f32 accumulation.  b1 is omitted — it
    # is exactly cancelled by the training-mode BatchNorm mean subtraction.
    h = jnp.dot(emb.astype(jnp.bfloat16), w1_ref[...],
                preferred_element_type=jnp.float32)        # (B, Hp) f32

    # bn1: training-mode batch statistics (biased variance), one-pass variance,
    # affine folded into a single FMA.
    mean = jnp.mean(h, axis=0, keepdims=True)              # (1, Hp)
    mean_sq = jnp.mean(h * h, axis=0, keepdims=True)       # (1, Hp)
    var = jnp.maximum(mean_sq - mean * mean, 0.0)          # biased var
    s = gamma * jax.lax.rsqrt(var + BN_EPS)                # (1, Hp)  EUP rsqrt
    t = beta - mean * s                                    # (1, Hp)
    hr = jnp.maximum(h * s + t, 0.0)                       # BN affine + ReLU

    # fc2: w2 stored bf16 only to halve its DMA; keep f32 activations/products
    # (tile is tiny, compute is free).  Output store is lane-dense (Op = 128).
    out = jnp.dot(hr, w2_ref[...].astype(jnp.float32),
                  preferred_element_type=jnp.float32) + b2
    out_ref[...] = out.astype(out_ref.dtype)


def prepare_head_params(w1, b1, gamma, beta, w2, b2):
    """Pad / pack / cast the classifier-head parameters ONCE at load time.

    b1 is accepted for interface parity but dropped: a bias feeding directly
    into training-mode BatchNorm is cancelled by the mean subtraction and is
    invariant for the variance.
    """
    del b1
    F, H = w1.shape
    O = w2.shape[1]
    Hp = pl.cdiv(H, LANE) * LANE
    Op = pl.cdiv(O, LANE) * LANE
    P = max(Hp, Op)

    # Lane-padded weights, stored bf16 (halves HBM bytes; native MXU pass).
    w1p = jnp.pad(w1.astype(jnp.float32), ((0, 0), (0, Hp - H))).astype(jnp.bfloat16)
    w2p = jnp.pad(w2.astype(jnp.float32),
                  ((0, Hp - H), (0, Op - O))).astype(jnp.bfloat16)

    # Pack the small per-feature params into one (3, P) array (single DMA).
    # Padded columns are inert: gamma=0 there -> s=0, t=0 -> hr=0.
    params = jnp.zeros((3, P), jnp.float32)
    params = params.at[0, :H].set(gamma.reshape(-1).astype(jnp.float32))
    params = params.at[1, :H].set(beta.reshape(-1).astype(jnp.float32))
    params = params.at[2, :O].set(b2.reshape(-1).astype(jnp.float32))

    return {"w1p": w1p, "w2p": w2p, "params": params,
            "F": F, "H": H, "O": O, "Hp": Hp, "Op": Op}


def bert_classifier_forward(cls_ids, emb_table, prep):
    """Forward path: one pallas_call (gather + fc1 + bn1 + relu + fc2)."""
    B = cls_ids.shape[0]
    F, O, Hp, Op = prep["F"], prep["O"], prep["Hp"], prep["Op"]
    P = prep["params"].shape[1]

    kernel = functools.partial(classifier_head_kernel, hp=Hp, op=Op, batch=B)

    cost = pl.CostEstimate(
        flops=2 * B * F * Hp + 2 * B * Hp * Op + 8 * B * Hp,
        transcendentals=Hp,
        bytes_accessed=(B * 4                     # cls ids
                        + B * F * 4               # gathered embedding rows
                        + F * Hp * 2              # w1 (bf16)
                        + 3 * P * 4               # packed gamma/beta/b2
                        + Hp * Op * 2             # w2 (bf16)
                        + B * Op * 4),            # output
    )

    grid_spec = pltpu.PrefetchScalarGridSpec(
        num_scalar_prefetch=1,                     # cls_ids -> SMEM
        grid=(1,),
        in_specs=[
            pl.BlockSpec(memory_space=pl.ANY),                 # emb table stays in HBM
            pl.BlockSpec((F, Hp), lambda i, ids: (0, 0)),      # fc1 weight (in, out)
            pl.BlockSpec((3, P), lambda i, ids: (0, 0)),       # packed [gamma; beta; b2]
            pl.BlockSpec((Hp, Op), lambda i, ids: (0, 0)),     # fc2 weight (in, out)
        ],
        out_specs=pl.BlockSpec((B, Op), lambda i, ids: (0, 0)),
        scratch_shapes=[
            pltpu.VMEM((B, F), jnp.float32),                   # gathered CLS embeddings
            pltpu.SemaphoreType.DMA((B,)),
        ],
    )

    out_padded = pl.pallas_call(
        kernel,
        out_shape=jax.ShapeDtypeStruct((B, Op), jnp.float32),
        grid_spec=grid_spec,
        compiler_params=pltpu.CompilerParams(
            dimension_semantics=("arbitrary",)),
        cost_estimate=cost,
    )(cls_ids, emb_table, prep["w1p"], prep["params"], prep["w2p"])

    return out_padded[:, :O]


def reference_forward(cls_ids, emb_table, w1, b1, gamma, beta, w2, b2):
    # Reference keeps b1 (to verify the BN-cancellation used in the kernel) and
    # applies the same bf16 rounding to the weights / pooled embedding.
    emb = emb_table[cls_ids].astype(jnp.bfloat16).astype(jnp.float32)
    w1f = w1.astype(jnp.bfloat16).astype(jnp.float32)
    w2f = w2.astype(jnp.bfloat16).astype(jnp.float32)
    h = jnp.dot(emb, w1f, precision=jax.lax.Precision.HIGHEST) + b1
    mean = jnp.mean(h, axis=0, keepdims=True)
    var = jnp.mean((h - mean) ** 2, axis=0, keepdims=True)
    hn = (h - mean) / jnp.sqrt(var + BN_EPS) * gamma + beta
    hr = jnp.maximum(hn, 0.0)
    return jnp.dot(hr, w2f, precision=jax.lax.Precision.HIGHEST) + b2


if __name__ == "__main__":
    key = jax.random.PRNGKey(0)
    k_tok, k_emb, k_w1, k_b1, k_g, k_be, k_w2, k_b2 = jax.random.split(key, 8)

    # Small shapes consistent with the module's forward:
    B, SEQ, VOCAB = 8, 8, 100        # token-id input x: (B, SEQ)
    F = 768                          # encoder hidden size (fixed by nn.Linear(768, ...))
    H = 32                           # hidden_size
    O = 8                            # output_size

    # Input: integer token ids (x.long() in the PyTorch forward).
    x = jax.random.randint(k_tok, (B, SEQ), 0, VOCAB, dtype=jnp.int32)

    # Synthetic deterministic "encoder": an embedding-table lookup.  Only the
    # SEQ-position-0 (CLS) rows feed the head (pooling_fn_cls_token), and the
    # kernel gathers those rows directly from HBM.
    emb_table = 0.02 * jax.random.normal(k_emb, (VOCAB, F), dtype=jnp.float32)

    # Deterministic parameter init (shapes per __init__); nn.Linear transposed.
    w1 = 0.02 * jax.random.normal(k_w1, (F, H), dtype=jnp.float32)       # fc1 weight^T
    b1 = 0.01 * jax.random.normal(k_b1, (1, H), dtype=jnp.float32)       # fc1 bias
    gamma = 1.0 + 0.1 * jax.random.normal(k_g, (1, H), dtype=jnp.float32)
    beta = 0.1 * jax.random.normal(k_be, (1, H), dtype=jnp.float32)
    w2 = 0.02 * jax.random.normal(k_w2, (H, O), dtype=jnp.float32)       # fc2 weight^T
    b2 = 0.01 * jax.random.normal(k_b2, (1, O), dtype=jnp.float32)       # fc2 bias

    # Parameter-load-time preparation (pad/pack/cast) — NOT in the forward path.
    prep = prepare_head_params(w1, b1, gamma, beta, w2, b2)
    prep = jax.tree_util.tree_map(
        lambda a: jax.block_until_ready(a) if isinstance(a, jax.Array) else a, prep)

    # Forward: CLS-token ids + one pallas_call.
    cls_ids = x[:, 0]                                       # (B,) int32
    out = bert_classifier_forward(cls_ids, emb_table, prep)
    out = jax.block_until_ready(out)

    ref = reference_forward(cls_ids, emb_table, w1, b1, gamma, beta, w2, b2)
    assert out.shape == (B, O)
    assert jnp.allclose(out, ref, atol=5e-4, rtol=5e-4), "mismatch vs reference"

    print("KERNEL_OK")
</pallas_src>

<mosaic_0001>
module attributes {stable_mosaic.version = 11 : i64} {
  func.func @classifier_head_kernel(%arg0: i32, %arg1: memref<8xi32, #tpu.memory_space<smem>>, %arg2: memref<100x768xf32, #tpu.memory_space<any>>, %arg3: memref<768x128xbf16, #tpu.memory_space<vmem>>, %arg4: memref<3x128xf32, #tpu.memory_space<vmem>>, %arg5: memref<128x128xbf16, #tpu.memory_space<vmem>>, %arg6: memref<8x128xf32, #tpu.memory_space<vmem>>, %arg7: memref<8x768xf32, #tpu.memory_space<vmem>>, %arg8: memref<8x!tpu.dma_semaphore, #tpu.memory_space<semaphore_mem>>) attributes {dimension_semantics = [#tpu.dimension_semantics<arbitrary>], iteration_bounds = array<i64: 1>, scalar_prefetch = 1 : i64, scratch_operands = 2 : i64, tpu.core_type = #tpu.core_type<tc>, window_params = [{}, {pipeline_mode = #tpu.pipeline_mode<synchronous>, transform_indices = @transform_1, window_bounds = array<i64: 768, 128>}, {pipeline_mode = #tpu.pipeline_mode<synchronous>, transform_indices = @transform_2, window_bounds = array<i64: 3, 128>}, {pipeline_mode = #tpu.pipeline_mode<synchronous>, transform_indices = @transform_3, window_bounds = array<i64: 128, 128>}, {pipeline_mode = #tpu.pipeline_mode<synchronous>, transform_indices = @transform_4, window_bounds = array<i64: 8, 128>}]} {
    %c0 = arith.constant 0 : index
    %0 = memref.load %arg1[%c0] : memref<8xi32, #tpu.memory_space<smem>>
    %c0_i32 = arith.constant 0 : i32
    %c0_i32_0 = arith.constant 0 : i32
    %1 = tpu.memref_slice %arg2[%0, %c0_i32_0] : memref<100x768xf32, #tpu.memory_space<any>> -> memref<1x768xf32, #tpu.memory_space<any>>
    %c0_i32_1 = arith.constant 0 : i32
    %c0_i32_2 = arith.constant 0 : i32
    %2 = tpu.memref_slice %arg7[%c0_i32_1, %c0_i32_2] : memref<8x768xf32, #tpu.memory_space<vmem>> -> memref<1x768xf32, #tpu.memory_space<vmem>>
    %3 = tpu.memref_slice %arg8[%c0_i32] : memref<8x!tpu.dma_semaphore, #tpu.memory_space<semaphore_mem>> -> memref<1x!tpu.dma_semaphore, #tpu.memory_space<semaphore_mem>>
    %4 = tpu.memref_squeeze %3 : memref<1x!tpu.dma_semaphore, #tpu.memory_space<semaphore_mem>> -> memref<!tpu.dma_semaphore, #tpu.memory_space<semaphore_mem>>
    tpu.enqueue_dma source(%1 : memref<1x768xf32, #tpu.memory_space<any>>) target(%2 : memref<1x768xf32, #tpu.memory_space<vmem>>) target_semaphore(%4 : memref<!tpu.dma_semaphore, #tpu.memory_space<semaphore_mem>>)
    %c1 = arith.constant 1 : index
    %5 = memref.load %arg1[%c1] : memref<8xi32, #tpu.memory_space<smem>>
    %c1_i32 = arith.constant 1 : i32
    %c0_i32_3 = arith.constant 0 : i32
    %6 = tpu.memref_slice %arg2[%5, %c0_i32_3] : memref<100x768xf32, #tpu.memory_space<any>> -> memref<1x768xf32, #tpu.memory_space<any>>
    %c1_i32_4 = arith.constant 1 : i32
    %c0_i32_5 = arith.constant 0 : i32
    %7 = tpu.memref_slice %arg7[%c1_i32_4, %c0_i32_5] : memref<8x768xf32, #tpu.memory_space<vmem>> -> memref<1x768xf32, #tpu.memory_space<vmem>>
    %8 = tpu.memref_slice %arg8[%c1_i32] : memref<8x!tpu.dma_semaphore, #tpu.memory_space<semaphore_mem>> -> memref<1x!tpu.dma_semaphore, #tpu.memory_space<semaphore_mem>>
    %9 = tpu.memref_squeeze %8 : memref<1x!tpu.dma_semaphore, #tpu.memory_space<semaphore_mem>> -> memref<!tpu.dma_semaphore, #tpu.memory_space<semaphore_mem>>
    tpu.enqueue_dma source(%6 : memref<1x768xf32, #tpu.memory_space<any>>) target(%7 : memref<1x768xf32, #tpu.memory_space<vmem>>) target_semaphore(%9 : memref<!tpu.dma_semaphore, #tpu.memory_space<semaphore_mem>>)
    %c2 = arith.constant 2 : index
    %10 = memref.load %arg1[%c2] : memref<8xi32, #tpu.memory_space<smem>>
    %c2_i32 = arith.constant 2 : i32
    %c0_i32_6 = arith.constant 0 : i32
    %11 = tpu.memref_slice %arg2[%10, %c0_i32_6] : memref<100x768xf32, #tpu.memory_space<any>> -> memref<1x768xf32, #tpu.memory_space<any>>
    %c2_i32_7 = arith.constant 2 : i32
    %c0_i32_8 = arith.constant 0 : i32
    %12 = tpu.memref_slice %arg7[%c2_i32_7, %c0_i32_8] : memref<8x768xf32, #tpu.memory_space<vmem>> -> memref<1x768xf32, #tpu.memory_space<vmem>>
    %13 = tpu.memref_slice %arg8[%c2_i32] : memref<8x!tpu.dma_semaphore, #tpu.memory_space<semaphore_mem>> -> memref<1x!tpu.dma_semaphore, #tpu.memory_space<semaphore_mem>>
    %14 = tpu.memref_squeeze %13 : memref<1x!tpu.dma_semaphore, #tpu.memory_space<semaphore_mem>> -> memref<!tpu.dma_semaphore, #tpu.memory_space<semaphore_mem>>
    tpu.enqueue_dma source(%11 : memref<1x768xf32, #tpu.memory_space<any>>) target(%12 : memref<1x768xf32, #tpu.memory_space<vmem>>) target_semaphore(%14 : memref<!tpu.dma_semaphore, #tpu.memory_space<semaphore_mem>>)
    %c3 = arith.constant 3 : index
    %15 = memref.load %arg1[%c3] : memref<8xi32, #tpu.memory_space<smem>>
    %c3_i32 = arith.constant 3 : i32
    %c0_i32_9 = arith.constant 0 : i32
    %16 = tpu.memref_slice %arg2[%15, %c0_i32_9] : memref<100x768xf32, #tpu.memory_space<any>> -> memref<1x768xf32, #tpu.memory_space<any>>
    %c3_i32_10 = arith.constant 3 : i32
    %c0_i32_11 = arith.constant 0 : i32
    %17 = tpu.memref_slice %arg7[%c3_i32_10, %c0_i32_11] : memref<8x768xf32, #tpu.memory_space<vmem>> -> memref<1x768xf32, #tpu.memory_space<vmem>>
    %18 = tpu.memref_slice %arg8[%c3_i32] : memref<8x!tpu.dma_semaphore, #tpu.memory_space<semaphore_mem>> -> memref<1x!tpu.dma_semaphore, #tpu.memory_space<semaphore_mem>>
    %19 = tpu.memref_squeeze %18 : memref<1x!tpu.dma_semaphore, #tpu.memory_space<semaphore_mem>> -> memref<!tpu.dma_semaphore, #tpu.memory_space<semaphore_mem>>
    tpu.enqueue_dma source(%16 : memref<1x768xf32, #tpu.memory_space<any>>) target(%17 : memref<1x768xf32, #tpu.memory_space<vmem>>) target_semaphore(%19 : memref<!tpu.dma_semaphore, #tpu.memory_space<semaphore_mem>>)
    %c4 = arith.constant 4 : index
    %20 = memref.load %arg1[%c4] : memref<8xi32, #tpu.memory_space<smem>>
    %c4_i32 = arith.constant 4 : i32
    %c0_i32_12 = arith.constant 0 : i32
    %21 = tpu.memref_slice %arg2[%20, %c0_i32_12] : memref<100x768xf32, #tpu.memory_space<any>> -> memref<1x768xf32, #tpu.memory_space<any>>
    %c4_i32_13 = arith.constant 4 : i32
    %c0_i32_14 = arith.constant 0 : i32
    %22 = tpu.memref_slice %arg7[%c4_i32_13, %c0_i32_14] : memref<8x768xf32, #tpu.memory_space<vmem>> -> memref<1x768xf32, #tpu.memory_space<vmem>>
    %23 = tpu.memref_slice %arg8[%c4_i32] : memref<8x!tpu.dma_semaphore, #tpu.memory_space<semaphore_mem>> -> memref<1x!tpu.dma_semaphore, #tpu.memory_space<semaphore_mem>>
    %24 = tpu.memref_squeeze %23 : memref<1x!tpu.dma_semaphore, #tpu.memory_space<semaphore_mem>> -> memref<!tpu.dma_semaphore, #tpu.memory_space<semaphore_mem>>
    tpu.enqueue_dma source(%21 : memref<1x768xf32, #tpu.memory_space<any>>) target(%22 : memref<1x768xf32, #tpu.memory_space<vmem>>) target_semaphore(%24 : memref<!tpu.dma_semaphore, #tpu.memory_space<semaphore_mem>>)
    %c5 = arith.constant 5 : index
    %25 = memref.load %arg1[%c5] : memref<8xi32, #tpu.memory_space<smem>>
    %c5_i32 = arith.constant 5 : i32
    %c0_i32_15 = arith.constant 0 : i32
    %26 = tpu.memref_slice %arg2[%25, %c0_i32_15] : memref<100x768xf32, #tpu.memory_space<any>> -> memref<1x768xf32, #tpu.memory_space<any>>
    %c5_i32_16 = arith.constant 5 : i32
    %c0_i32_17 = arith.constant 0 : i32
    %27 = tpu.memref_slice %arg7[%c5_i32_16, %c0_i32_17] : memref<8x768xf32, #tpu.memory_space<vmem>> -> memref<1x768xf32, #tpu.memory_space<vmem>>
    %28 = tpu.memref_slice %arg8[%c5_i32] : memref<8x!tpu.dma_semaphore, #tpu.memory_space<semaphore_mem>> -> memref<1x!tpu.dma_semaphore, #tpu.memory_space<semaphore_mem>>
    %29 = tpu.memref_squeeze %28 : memref<1x!tpu.dma_semaphore, #tpu.memory_space<semaphore_mem>> -> memref<!tpu.dma_semaphore, #tpu.memory_space<semaphore_mem>>
    tpu.enqueue_dma source(%26 : memref<1x768xf32, #tpu.memory_space<any>>) target(%27 : memref<1x768xf32, #tpu.memory_space<vmem>>) target_semaphore(%29 : memref<!tpu.dma_semaphore, #tpu.memory_space<semaphore_mem>>)
    %c6 = arith.constant 6 : index
    %30 = memref.load %arg1[%c6] : memref<8xi32, #tpu.memory_space<smem>>
    %c6_i32 = arith.constant 6 : i32
    %c0_i32_18 = arith.constant 0 : i32
    %31 = tpu.memref_slice %arg2[%30, %c0_i32_18] : memref<100x768xf32, #tpu.memory_space<any>> -> memref<1x768xf32, #tpu.memory_space<any>>
    %c6_i32_19 = arith.constant 6 : i32
    %c0_i32_20 = arith.constant 0 : i32
    %32 = tpu.memref_slice %arg7[%c6_i32_19, %c0_i32_20] : memref<8x768xf32, #tpu.memory_space<vmem>> -> memref<1x768xf32, #tpu.memory_space<vmem>>
    %33 = tpu.memref_slice %arg8[%c6_i32] : memref<8x!tpu.dma_semaphore, #tpu.memory_space<semaphore_mem>> -> memref<1x!tpu.dma_semaphore, #tpu.memory_space<semaphore_mem>>
    %34 = tpu.memref_squeeze %33 : memref<1x!tpu.dma_semaphore, #tpu.memory_space<semaphore_mem>> -> memref<!tpu.dma_semaphore, #tpu.memory_space<semaphore_mem>>
    tpu.enqueue_dma source(%31 : memref<1x768xf32, #tpu.memory_space<any>>) target(%32 : memref<1x768xf32, #tpu.memory_space<vmem>>) target_semaphore(%34 : memref<!tpu.dma_semaphore, #tpu.memory_space<semaphore_mem>>)
    %c7 = arith.constant 7 : index
    %35 = memref.load %arg1[%c7] : memref<8xi32, #tpu.memory_space<smem>>
    %c7_i32 = arith.constant 7 : i32
    %c0_i32_21 = arith.constant 0 : i32
    %36 = tpu.memref_slice %arg2[%35, %c0_i32_21] : memref<100x768xf32, #tpu.memory_space<any>> -> memref<1x768xf32, #tpu.memory_space<any>>
    %c7_i32_22 = arith.constant 7 : i32
    %c0_i32_23 = arith.constant 0 : i32
    %37 = tpu.memref_slice %arg7[%c7_i32_22, %c0_i32_23] : memref<8x768xf32, #tpu.memory_space<vmem>> -> memref<1x768xf32, #tpu.memory_space<vmem>>
    %38 = tpu.memref_slice %arg8[%c7_i32] : memref<8x!tpu.dma_semaphore, #tpu.memory_space<semaphore_mem>> -> memref<1x!tpu.dma_semaphore, #tpu.memory_space<semaphore_mem>>
    %39 = tpu.memref_squeeze %38 : memref<1x!tpu.dma_semaphore, #tpu.memory_space<semaphore_mem>> -> memref<!tpu.dma_semaphore, #tpu.memory_space<semaphore_mem>>
    tpu.enqueue_dma source(%36 : memref<1x768xf32, #tpu.memory_space<any>>) target(%37 : memref<1x768xf32, #tpu.memory_space<vmem>>) target_semaphore(%39 : memref<!tpu.dma_semaphore, #tpu.memory_space<semaphore_mem>>)
    %c0_i32_24 = arith.constant 0 : i32
    %c0_i32_25 = arith.constant 0 : i32
    %40 = tpu.memref_slice %arg2[%0, %c0_i32_25] : memref<100x768xf32, #tpu.memory_space<any>> -> memref<1x768xf32, #tpu.memory_space<any>>
    %c0_i32_26 = arith.constant 0 : i32
    %c0_i32_27 = arith.constant 0 : i32
    %41 = tpu.memref_slice %arg7[%c0_i32_26, %c0_i32_27] : memref<8x768xf32, #tpu.memory_space<vmem>> -> memref<1x768xf32, #tpu.memory_space<vmem>>
    %42 = tpu.memref_slice %arg8[%c0_i32_24] : memref<8x!tpu.dma_semaphore, #tpu.memory_space<semaphore_mem>> -> memref<1x!tpu.dma_semaphore, #tpu.memory_space<semaphore_mem>>
    %43 = tpu.memref_squeeze %42 : memref<1x!tpu.dma_semaphore, #tpu.memory_space<semaphore_mem>> -> memref<!tpu.dma_semaphore, #tpu.memory_space<semaphore_mem>>
    tpu.wait_dma2 semaphore(%43 : memref<!tpu.dma_semaphore, #tpu.memory_space<semaphore_mem>>) src(%40 : memref<1x768xf32, #tpu.memory_space<any>>) dst(%41 : memref<1x768xf32, #tpu.memory_space<vmem>>)
    %c1_i32_28 = arith.constant 1 : i32
    %c0_i32_29 = arith.constant 0 : i32
    %44 = tpu.memref_slice %arg2[%5, %c0_i32_29] : memref<100x768xf32, #tpu.memory_space<any>> -> memref<1x768xf32, #tpu.memory_space<any>>
    %c1_i32_30 = arith.constant 1 : i32
    %c0_i32_31 = arith.constant 0 : i32
    %45 = tpu.memref_slice %arg7[%c1_i32_30, %c0_i32_31] : memref<8x768xf32, #tpu.memory_space<vmem>> -> memref<1x768xf32, #tpu.memory_space<vmem>>
    %46 = tpu.memref_slice %arg8[%c1_i32_28] : memref<8x!tpu.dma_semaphore, #tpu.memory_space<semaphore_mem>> -> memref<1x!tpu.dma_semaphore, #tpu.memory_space<semaphore_mem>>
    %47 = tpu.memref_squeeze %46 : memref<1x!tpu.dma_semaphore, #tpu.memory_space<semaphore_mem>> -> memref<!tpu.dma_semaphore, #tpu.memory_space<semaphore_mem>>
    tpu.wait_dma2 semaphore(%47 : memref<!tpu.dma_semaphore, #tpu.memory_space<semaphore_mem>>) src(%44 : memref<1x768xf32, #tpu.memory_space<any>>) dst(%45 : memref<1x768xf32, #tpu.memory_space<vmem>>)
    %c2_i32_32 = arith.constant 2 : i32
    %c0_i32_33 = arith.constant 0 : i32
    %48 = tpu.memref_slice %arg2[%10, %c0_i32_33] : memref<100x768xf32, #tpu.memory_space<any>> -> memref<1x768xf32, #tpu.memory_space<any>>
    %c2_i32_34 = arith.constant 2 : i32
    %c0_i32_35 = arith.constant 0 : i32
    %49 = tpu.memref_slice %arg7[%c2_i32_34, %c0_i32_35] : memref<8x768xf32, #tpu.memory_space<vmem>> -> memref<1x768xf32, #tpu.memory_space<vmem>>
    %50 = tpu.memref_slice %arg8[%c2_i32_32] : memref<8x!tpu.dma_semaphore, #tpu.memory_space<semaphore_mem>> -> memref<1x!tpu.dma_semaphore, #tpu.memory_space<semaphore_mem>>
    %51 = tpu.memref_squeeze %50 : memref<1x!tpu.dma_semaphore, #tpu.memory_space<semaphore_mem>> -> memref<!tpu.dma_semaphore, #tpu.memory_space<semaphore_mem>>
    tpu.wait_dma2 semaphore(%51 : memref<!tpu.dma_semaphore, #tpu.memory_space<semaphore_mem>>) src(%48 : memref<1x768xf32, #tpu.memory_space<any>>) dst(%49 : memref<1x768xf32, #tpu.memory_space<vmem>>)
    %c3_i32_36 = arith.constant 3 : i32
    %c0_i32_37 = arith.constant 0 : i32
    %52 = tpu.memref_slice %arg2[%15, %c0_i32_37] : memref<100x768xf32, #tpu.memory_space<any>> -> memref<1x768xf32, #tpu.memory_space<any>>
    %c3_i32_38 = arith.constant 3 : i32
    %c0_i32_39 = arith.constant 0 : i32
    %53 = tpu.memref_slice %arg7[%c3_i32_38, %c0_i32_39] : memref<8x768xf32, #tpu.memory_space<vmem>> -> memref<1x768xf32, #tpu.memory_space<vmem>>
    %54 = tpu.memref_slice %arg8[%c3_i32_36] : memref<8x!tpu.dma_semaphore, #tpu.memory_space<semaphore_mem>> -> memref<1x!tpu.dma_semaphore, #tpu.memory_space<semaphore_mem>>
    %55 = tpu.memref_squeeze %54 : memref<1x!tpu.dma_semaphore, #tpu.memory_space<semaphore_mem>> -> memref<!tpu.dma_semaphore, #tpu.memory_space<semaphore_mem>>
    tpu.wait_dma2 semaphore(%55 : memref<!tpu.dma_semaphore, #tpu.memory_space<semaphore_mem>>) src(%52 : memref<1x768xf32, #tpu.memory_space<any>>) dst(%53 : memref<1x768xf32, #tpu.memory_space<vmem>>)
    %c4_i32_40 = arith.constant 4 : i32
    %c0_i32_41 = arith.constant 0 : i32
    %56 = tpu.memref_slice %arg2[%20, %c0_i32_41] : memref<100x768xf32, #tpu.memory_space<any>> -> memref<1x768xf32, #tpu.memory_space<any>>
    %c4_i32_42 = arith.constant 4 : i32
    %c0_i32_43 = arith.constant 0 : i32
    %57 = tpu.memref_slice %arg7[%c4_i32_42, %c0_i32_43] : memref<8x768xf32, #tpu.memory_space<vmem>> -> memref<1x768xf32, #tpu.memory_space<vmem>>
    %58 = tpu.memref_slice %arg8[%c4_i32_40] : memref<8x!tpu.dma_semaphore, #tpu.memory_space<semaphore_mem>> -> memref<1x!tpu.dma_semaphore, #tpu.memory_space<semaphore_mem>>
    %59 = tpu.memref_squeeze %58 : memref<1x!tpu.dma_semaphore, #tpu.memory_space<semaphore_mem>> -> memref<!tpu.dma_semaphore, #tpu.memory_space<semaphore_mem>>
    tpu.wait_dma2 semaphore(%59 : memref<!tpu.dma_semaphore, #tpu.memory_space<semaphore_mem>>) src(%56 : memref<1x768xf32, #tpu.memory_space<any>>) dst(%57 : memref<1x768xf32, #tpu.memory_space<vmem>>)
    %c5_i32_44 = arith.constant 5 : i32
    %c0_i32_45 = arith.constant 0 : i32
    %60 = tpu.memref_slice %arg2[%25, %c0_i32_45] : memref<100x768xf32, #tpu.memory_space<any>> -> memref<1x768xf32, #tpu.memory_space<any>>
    %c5_i32_46 = arith.constant 5 : i32
    %c0_i32_47 = arith.constant 0 : i32
    %61 = tpu.memref_slice %arg7[%c5_i32_46, %c0_i32_47] : memref<8x768xf32, #tpu.memory_space<vmem>> -> memref<1x768xf32, #tpu.memory_space<vmem>>
    %62 = tpu.memref_slice %arg8[%c5_i32_44] : memref<8x!tpu.dma_semaphore, #tpu.memory_space<semaphore_mem>> -> memref<1x!tpu.dma_semaphore, #tpu.memory_space<semaphore_mem>>
    %63 = tpu.memref_squeeze %62 : memref<1x!tpu.dma_semaphore, #tpu.memory_space<semaphore_mem>> -> memref<!tpu.dma_semaphore, #tpu.memory_space<semaphore_mem>>
    tpu.wait_dma2 semaphore(%63 : memref<!tpu.dma_semaphore, #tpu.memory_space<semaphore_mem>>) src(%60 : memref<1x768xf32, #tpu.memory_space<any>>) dst(%61 : memref<1x768xf32, #tpu.memory_space<vmem>>)
    %c6_i32_48 = arith.constant 6 : i32
    %c0_i32_49 = arith.constant 0 : i32
    %64 = tpu.memref_slice %arg2[%30, %c0_i32_49] : memref<100x768xf32, #tpu.memory_space<any>> -> memref<1x768xf32, #tpu.memory_space<any>>
    %c6_i32_50 = arith.constant 6 : i32
    %c0_i32_51 = arith.constant 0 : i32
    %65 = tpu.memref_slice %arg7[%c6_i32_50, %c0_i32_51] : memref<8x768xf32, #tpu.memory_space<vmem>> -> memref<1x768xf32, #tpu.memory_space<vmem>>
    %66 = tpu.memref_slice %arg8[%c6_i32_48] : memref<8x!tpu.dma_semaphore, #tpu.memory_space<semaphore_mem>> -> memref<1x!tpu.dma_semaphore, #tpu.memory_space<semaphore_mem>>
    %67 = tpu.memref_squeeze %66 : memref<1x!tpu.dma_semaphore, #tpu.memory_space<semaphore_mem>> -> memref<!tpu.dma_semaphore, #tpu.memory_space<semaphore_mem>>
    tpu.wait_dma2 semaphore(%67 : memref<!tpu.dma_semaphore, #tpu.memory_space<semaphore_mem>>) src(%64 : memref<1x768xf32, #tpu.memory_space<any>>) dst(%65 : memref<1x768xf32, #tpu.memory_space<vmem>>)
    %c7_i32_52 = arith.constant 7 : i32
    %c0_i32_53 = arith.constant 0 : i32
    %68 = tpu.memref_slice %arg2[%35, %c0_i32_53] : memref<100x768xf32, #tpu.memory_space<any>> -> memref<1x768xf32, #tpu.memory_space<any>>
    %c7_i32_54 = arith.constant 7 : i32
    %c0_i32_55 = arith.constant 0 : i32
    %69 = tpu.memref_slice %arg7[%c7_i32_54, %c0_i32_55] : memref<8x768xf32, #tpu.memory_space<vmem>> -> memref<1x768xf32, #tpu.memory_space<vmem>>
    %70 = tpu.memref_slice %arg8[%c7_i32_52] : memref<8x!tpu.dma_semaphore, #tpu.memory_space<semaphore_mem>> -> memref<1x!tpu.dma_semaphore, #tpu.memory_space<semaphore_mem>>
    %71 = tpu.memref_squeeze %70 : memref<1x!tpu.dma_semaphore, #tpu.memory_space<semaphore_mem>> -> memref<!tpu.dma_semaphore, #tpu.memory_space<semaphore_mem>>
    tpu.wait_dma2 semaphore(%71 : memref<!tpu.dma_semaphore, #tpu.memory_space<semaphore_mem>>) src(%68 : memref<1x768xf32, #tpu.memory_space<any>>) dst(%69 : memref<1x768xf32, #tpu.memory_space<vmem>>)
    %c0_56 = arith.constant 0 : index
    %c0_57 = arith.constant 0 : index
    %72 = vector.load %arg7[%c0_56, %c0_57] : memref<8x768xf32, #tpu.memory_space<vmem>>, vector<8x768xf32>
    %c0_58 = arith.constant 0 : index
    %c0_59 = arith.constant 0 : index
    %73 = vector.load %arg4[%c0_58, %c0_59] : memref<3x128xf32, #tpu.memory_space<vmem>>, vector<3x128xf32>
    %74 = vector.extract_strided_slice %73 {offsets = [0, 0], sizes = [1, 128], strides = [1, 1]} : vector<3x128xf32> to vector<1x128xf32>
    %75 = vector.extract_strided_slice %73 {offsets = [1, 0], sizes = [1, 128], strides = [1, 1]} : vector<3x128xf32> to vector<1x128xf32>
    %76 = vector.extract_strided_slice %73 {offsets = [2, 0], sizes = [1, 128], strides = [1, 1]} : vector<3x128xf32> to vector<1x128xf32>
    %77 = arith.truncf %72 : vector<8x768xf32> to vector<8x768xbf16>
    %c0_60 = arith.constant 0 : index
    %c0_61 = arith.constant 0 : index
    %78 = vector.load %arg3[%c0_60, %c0_61] : memref<768x128xbf16, #tpu.memory_space<vmem>>, vector<768x128xbf16>
    %cst = arith.constant dense<0.000000e+00> : vector<8x128xf32>
    %79 = tpu.matmul %77, %78, %cst {dimension_numbers = #tpu.dot_dimension_numbers<[1], [0], [0], [1], [0, 0, 1, 1], [], []>} : vector<8x768xbf16>, vector<768x128xbf16>, vector<8x128xf32> -> vector<8x128xf32>
    %cst_62 = arith.constant dense<0.000000e+00> : vector<128xf32>
    %80 = vector.multi_reduction <add>, %79, %cst_62 [0] : vector<8x128xf32> to vector<128xf32>
    %81 = vector.shape_cast %80 : vector<128xf32> to vector<1x128xf32>
    %cst_63 = arith.constant 8.000000e+00 : f32
    %82 = vector.broadcast %cst_63 : f32 to vector<1x128xf32>
    %83 = arith.divf %81, %82 : vector<1x128xf32>
    %84 = arith.mulf %79, %79 : vector<8x128xf32>
    %cst_64 = arith.constant dense<0.000000e+00> : vector<128xf32>
    %85 = vector.multi_reduction <add>, %84, %cst_64 [0] : vector<8x128xf32> to vector<128xf32>
    %86 = vector.shape_cast %85 : vector<128xf32> to vector<1x128xf32>
    %cst_65 = arith.constant 8.000000e+00 : f32
    %87 = vector.broadcast %cst_65 : f32 to vector<1x128xf32>
    %88 = arith.divf %86, %87 : vector<1x128xf32>
    %89 = arith.mulf %83, %83 : vector<1x128xf32>
    %90 = arith.subf %88, %89 : vector<1x128xf32>
    %cst_66 = arith.constant 0.000000e+00 : f32
    %91 = vector.broadcast %cst_66 : f32 to vector<1x128xf32>
    %92 = arith.maximumf %90, %91 : vector<1x128xf32>
    %cst_67 = arith.constant 9.99999974E-6 : f32
    %93 = vector.broadcast %cst_67 : f32 to vector<1x128xf32>
    %94 = arith.addf %92, %93 : vector<1x128xf32>
    %95 = math.rsqrt %94 : vector<1x128xf32>
    %96 = arith.mulf %74, %95 : vector<1x128xf32>
    %97 = arith.mulf %83, %96 : vector<1x128xf32>
    %98 = arith.subf %75, %97 : vector<1x128xf32>
    %99 = vector.broadcast %96 : vector<1x128xf32> to vector<8x128xf32>
    %100 = arith.mulf %79, %99 : vector<8x128xf32>
    %101 = vector.broadcast %98 : vector<1x128xf32> to vector<8x128xf32>
    %102 = arith.addf %100, %101 : vector<8x128xf32>
    %cst_68 = arith.constant 0.000000e+00 : f32
    %103 = vector.broadcast %cst_68 : f32 to vector<8x128xf32>
    %104 = arith.maximumf %102, %103 : vector<8x128xf32>
    %c0_69 = arith.constant 0 : index
    %c0_70 = arith.constant 0 : index
    %105 = vector.load %arg5[%c0_69, %c0_70] : memref<128x128xbf16, #tpu.memory_space<vmem>>, vector<128x128xbf16>
    %106 = arith.extf %105 : vector<128x128xbf16> to vector<128x128xf32>
    %cst_71 = arith.constant dense<0.000000e+00> : vector<8x128xf32>
    %107 = tpu.matmul %104, %106, %cst_71 {dimension_numbers = #tpu.dot_dimension_numbers<[1], [0], [0], [1], [0, 0, 1, 1], [], []>} : vector<8x128xf32>, vector<128x128xf32>, vector<8x128xf32> -> vector<8x128xf32>
    %108 = vector.broadcast %76 : vector<1x128xf32> to vector<8x128xf32>
    %109 = arith.addf %107, %108 : vector<8x128xf32>
    %c0_72 = arith.constant 0 : index
    %c0_73 = arith.constant 0 : index
    %110 = vector.load %arg6[%c0_72, %c0_73] : memref<8x128xf32, #tpu.memory_space<vmem>>, vector<8x128xf32>
    tpu.vector_store %arg6[%c0_72, %c0_73], %109 {strides = array<i32>} : memref<8x128xf32, #tpu.memory_space<vmem>>, vector<8x128xf32>,
    return
  }
  func.func @transform_1(%arg0: i32, %arg1: memref<8xi32, #tpu.memory_space<smem>>) -> (i32, i32) {
    %c0_i32 = arith.constant 0 : i32
    %c0_i32_0 = arith.constant 0 : i32
    %c0_i32_1 = arith.constant 0 : i32
    return %c0_i32, %c0_i32_0 : i32, i32
  }
  func.func @transform_2(%arg0: i32, %arg1: memref<8xi32, #tpu.memory_space<smem>>) -> (i32, i32) {
    %c0_i32 = arith.constant 0 : i32
    %c0_i32_0 = arith.constant 0 : i32
    %c0_i32_1 = arith.constant 0 : i32
    return %c0_i32, %c0_i32_0 : i32, i32
  }
  func.func @transform_3(%arg0: i32, %arg1: memref<8xi32, #tpu.memory_space<smem>>) -> (i32, i32) {
    %c0_i32 = arith.constant 0 : i32
    %c0_i32_0 = arith.constant 0 : i32
    %c0_i32_1 = arith.constant 0 : i32
    return %c0_i32, %c0_i32_0 : i32, i32
  }
  func.func @transform_4(%arg0: i32, %arg1: memref<8xi32, #tpu.memory_space<smem>>) -> (i32, i32) {
    %c0_i32 = arith.constant 0 : i32
    %c0_i32_0 = arith.constant 0 : i32
    %c0_i32_1 = arith.constant 0 : i32
    return %c0_i32, %c0_i32_0 : i32, i32
  }
}

</mosaic_0001>

<bundles_post_ra>
// kernel: tpu_custom_call.1
= control target key start
LH: loop header
LB: loop body
LE: loop exit
PB: predicated region body
PF: predicated region fallthrough
CT: control target
= control target key end

     0   :  { %s1526_s21 = smov [#allocation5]   ;;  %s1722_s0 = inlined_call_operand.hbm [shape: s32[8], index: 0, kind: input, shape index: {}]   ;;  %s1723_s1 = inlined_call_operand.hbm [shape: f32[100,768], index: 1, kind: input, shape index: {}]   ;;  %s1724_s2 = inlined_call_operand.hbm [shape: bf16[768,128], index: 2, kind: input, shape index: {}]   ;;  %s1725_s3 = inlined_call_operand.hbm [shape: f32[3,128], index: 3, kind: input, shape index: {}]   ;;  %s1726_s4 = inlined_call_operand.hbm [shape: bf16[128,128], index: 4, kind: input, shape index: {}]   ;;  %s1727_s5 = inlined_call_operand.hbm [shape: f32[8,128], index: 5, kind: output, shape index: {}]  }
   0x1   :  { %s11_s20 = sshll.u32 %s1722_s0, 4  ;;  %s12_s20 = int_to_ptr.hbm [resolvable:$true] %s11_s20 }
   0x2   :  { %14 = dma.hbm_to_smem %s12_s20, 16, %s1526_s21, [#allocation4] }
   0x3   :  { %1502 = dma.done.wait [#allocation4], 16 }
   0x4   :  { %1503 = vsyncadd [#allocation4], 4294967280 }
   0x5   :  { %17 = sfence }
   0x6   :  { %18 = vsyncpa [#allocation7], 0 }
   0x7   :  { %19 = vsyncpa [#allocation10], 0  ;;  %s39_s24 = sshll.u32 %s1725_s3, 4  ;;  %s40_s24 = int_to_ptr.hbm [resolvable:$true] %s39_s24 }
   0x8   :  { %20 = vsyncpa [#allocation8], 0  ;;  %s1527_s25 = smov [#allocation9]   ;;  %s25_s0 = sshll.u32 %s1724_s2, 4  ;;  %s26_s0 = int_to_ptr.hbm [resolvable:$true] %s25_s0 }
   0x9   :  { %s41_s26 = sshll.u32 %s1527_s25, 4  ;;  %s1528_s29 = smov [#allocation6]   ;;  %s42_s26 = int_to_ptr.vmem [resolvable:$true] %s41_s26 }
   0xa   :  { %44 = dma.hbm_to_vmem [thread:$0]  %s40_s24, 64, %s42_s26, [#allocation10]  }
   0xb   :  { %s27_s30 = sshll.u32 %s1528_s29, 4  ;;  %s1529_s6 = smov 64   ;;  %s28_s30 = int_to_ptr.vmem [resolvable:$true] %s27_s30 }
   0xc   :  { %s1530_s7 = smov 4   ;;  %s49_s3 = sshll.u32 %s1726_s4, 4  ;;  %s50_s3 = int_to_ptr.hbm [resolvable:$true] %s49_s3 }
   0xd   :  { %33 = dma.hbm_to_vmem [thread:$0]  %s26_s0, 6144, %s28_s30, [#allocation7], %s1529_s6, %s1529_s6, %s1530_s7  }
   0xe   :  { %s1531_s10 = smov [#allocation11]  }
   0xf   :  { %s51_s11 = sshll.u32 %s1531_s10, 4  ;;  %s52_s11 = int_to_ptr.vmem [resolvable:$true] %s51_s11 }
  0x10   :  { %57 = dma.hbm_to_vmem [thread:$0]  %s50_s3, 1024, %s52_s11, [#allocation10], %s1529_s6, %s1529_s6, %s1530_s7  }
  0x11   :  { %1504 = dma.done.wait [#allocation7], 6144  }
  0x12   :  { %1505 = vsyncadd [#allocation7], 4294961152 }
  0x13   :  { %1506 = dma.done.wait [#allocation10], 1088  }
  0x14   :  { %1507 = vsyncadd [#allocation10], 4294966208  ;;  %s70_s2 = sld [smem:[#allocation5]]  ;;  %s1532_s12 = smov [#allocation2]  }
  0x15   :  { %s1586_s13 = sshll.u32 %s1532_s12, 4  ;;  %s886_s14 = sld [smem:[#allocation5 + $0x1]]  ;;  %s79_s13 = int_to_ptr.vmem [resolvable:$true] %s1586_s13 }
  0x16   :  { %s1533_s15 = smov [#allocation2 + $0x1]   ;;  %s1591_s4 = sld [smem:[#allocation5 + $0x2]] }
  0x17   :  { %s1589_s16 = sshll.u32 %s1533_s15, 4  ;;  %s1534_s17 = smov [#allocation2 + $0x2]   ;;  %s95_s16 = int_to_ptr.vmem [resolvable:$true] %s1589_s16 }
  0x18   :  { %s1594_s18 = sshll.u32 %s1534_s17, 4  ;;  %s1596_s19 = sld [smem:[#allocation5 + $0x3]]  ;;  %s111_s18 = int_to_ptr.vmem [resolvable:$true] %s1594_s18 }
  0x19   :  { %s1609_s12 = scalar_lea.hbm %s1723_s1, 624 }
  0x1a   :  { %s71_s20 = sshrl.u32 %s70_s2, 3  ;;  %s72_s21 = sand.u32 7, %s70_s2  }
  0x1b   :  { %s73_s22 = smul.u32 48, %s71_s20  ;;  %s85_s23 = sshrl.u32 %s886_s14, 3 }
  0x1c   :  { %s86_s24 = sand.u32 7, %s886_s14   ;;  %s87_s26 = smul.u32 48, %s85_s23 }
  0x1d   :  { %s74_s25 = sadd.s32 %s73_s22, %s72_s21  ;;  %s101_s29 = sshrl.u32 %s1591_s4, 3 }
  0x1e   :  { %s75_s0 = scalar_lea.hbm %s1723_s1, %s74_s25  ;;  %s88_s6 = sadd.s32 %s87_s26, %s86_s24 }
  0x1f   :  { %s76_s30 = sshll.u32 %s75_s0, 4  ;;  %s89_s9 = scalar_lea.hbm %s1723_s1, %s88_s6  ;;  %s77_s30 = int_to_ptr.hbm [resolvable:$true] %s76_s30 }
  0x20   :  { %s1286_s3 = sshra.s32 %s77_s30, 4  ;;  %s1287_s3 = int_to_ptr.hbm [resolvable:$true] %s1286_s3 }
  0x21   :  { %s1288_s10 = scalar_lea.hbm %s1287_s3, 6  ;;  %p1291_p1 = scmp.lt.s32.totalorder %s1287_s3, %s1723_s1 }
  0x22   :  { %p1289_p0 = scmp.ne.s32.totalorder %s1287_s3, %s1288_s10  ;;  %p1292_p2 = scmp.lt.s32.totalorder %s1609_s12, %s1288_s10 }
  0x24   :  { %p1293_p3 = por %p1292_p2, %p1291_p1 }
  0x26   :  { %p1294_p4 = pnand %p1293_p3, %p1289_p0 }
  0x28   :  { %1297 = shalt.err (!%p1294_p4)  }
  0x29   :  { %s1535_s17 = smov 128   ;;  %s1536_s20 = smov 1  }
  0x2a   :  { %83 = dma.hbm_to_vmem [thread:$0]  %s77_s30, 96, %s79_s13, [#allocation3], %s1535_s17, %s1535_s17, %s1536_s20 }
  0x2b   :  { %s92_s21 = sshll.u32 %s89_s9, 4  ;;  %s102_s22 = sand.u32 7, %s1591_s4   ;;  %s93_s21 = int_to_ptr.hbm [resolvable:$true] %s92_s21 }
  0x2c   :  { %s103_s23 = smul.u32 48, %s101_s29  ;;  %s1310_s24 = sshra.s32 %s93_s21, 4  ;;  %s1311_s24 = int_to_ptr.hbm [resolvable:$true] %s1310_s24 }
  0x2d   :  { %s1312_s25 = scalar_lea.hbm %s1311_s24, 6  ;;  %p1315_p6 = scmp.lt.s32.totalorder %s1311_s24, %s1723_s1 }
  0x2e   :  { %p1313_p5 = scmp.ne.s32.totalorder %s1311_s24, %s1312_s25  ;;  %p1316_p7 = scmp.lt.s32.totalorder %s1609_s12, %s1312_s25 }
  0x30   :  { %p1317_p8 = por %p1316_p7, %p1315_p6 }
  0x32   :  { %p1318_p9 = pnand %p1317_p8, %p1313_p5 }
  0x34   :  { %1321 = shalt.err (!%p1318_p9)  }
  0x35   :  { %99 = dma.hbm_to_vmem [thread:$0]  %s93_s21, 96, %s95_s16, [#allocation3 + $0x1], %s1535_s17, %s1535_s17, %s1536_s20 }
  0x36   :  { %s104_s13 = sadd.s32 %s103_s23, %s102_s22  ;;  %s117_s4 = sshrl.u32 %s1596_s19, 3 }
  0x37   :  { %s105_s29 = scalar_lea.hbm %s1723_s1, %s104_s13  ;;  %s118_s30 = sand.u32 7, %s1596_s19  }
  0x38   :  { %s108_s6 = sshll.u32 %s105_s29, 4  ;;  %s119_s7 = smul.u32 48, %s117_s4  ;;  %s109_s6 = int_to_ptr.hbm [resolvable:$true] %s108_s6 }
  0x39   :  { %s1334_s8 = sshra.s32 %s109_s6, 4  ;;  %s1335_s8 = int_to_ptr.hbm [resolvable:$true] %s1334_s8 }
  0x3a   :  { %s1336_s9 = scalar_lea.hbm %s1335_s8, 6  ;;  %p1339_p11 = scmp.lt.s32.totalorder %s1335_s8, %s1723_s1 }
  0x3b   :  { %p1337_p10 = scmp.ne.s32.totalorder %s1335_s8, %s1336_s9  ;;  %p1340_p12 = scmp.lt.s32.totalorder %s1609_s12, %s1336_s9 }
  0x3d   :  { %p1341_p13 = por %p1340_p12, %p1339_p11 }
  0x3f   :  { %p1342_p0 = pnand %p1341_p13, %p1337_p10 }
  0x41   :  { %1345 = shalt.err (!%p1342_p0)  }
  0x42   :  { %115 = dma.hbm_to_vmem [thread:$0]  %s109_s6, 96, %s111_s18, [#allocation3 + $0x2], %s1535_s17, %s1535_s17, %s1536_s20 }
  0x43   :  { %s120_s16 = sadd.s32 %s119_s7, %s118_s30  ;;  %s1537_s19 = smov [#allocation2 + $0x3]  }
  0x44   :  { %s126_s11 = sshll.u32 %s1537_s19, 4  ;;  %s121_s15 = scalar_lea.hbm %s1723_s1, %s120_s16  ;;  %s127_s11 = int_to_ptr.vmem [resolvable:$true] %s126_s11 }
  0x45   :  { %s124_s21 = sshll.u32 %s121_s15, 4  ;;  %s889_s22 = sld [smem:[#allocation5 + $0x4]]  ;;  %s125_s21 = int_to_ptr.hbm [resolvable:$true] %s124_s21 }
  0x46   :  { %s1358_s23 = sshra.s32 %s125_s21, 4  ;;  %s1359_s23 = int_to_ptr.hbm [resolvable:$true] %s1358_s23 }
  0x47   :  { %s1360_s24 = scalar_lea.hbm %s1359_s23, 6  ;;  %p1363_p2 = scmp.lt.s32.totalorder %s1359_s23, %s1723_s1 }
  0x48   :  { %p1361_p1 = scmp.ne.s32.totalorder %s1359_s23, %s1360_s24  ;;  %p1364_p3 = scmp.lt.s32.totalorder %s1609_s12, %s1360_s24 }
  0x4a   :  { %p1365_p4 = por %p1364_p3, %p1363_p2 }
  0x4c   :  { %p1366_p5 = pnand %p1365_p4, %p1361_p1 }
  0x4e   :  { %1369 = shalt.err (!%p1366_p5)  }
  0x4f   :  { %131 = dma.hbm_to_vmem [thread:$0]  %s125_s21, 96, %s127_s11, [#allocation3 + $0x3], %s1535_s17, %s1535_s17, %s1536_s20 }
  0x50   :  { %s1538_s18 = smov [#allocation2 + $0x4]   ;;  %s1656_s13 = sld [smem:[#allocation5 + $0x5]] }
  0x51   :  { %s1654_s27 = sshll.u32 %s1538_s18, 4  ;;  %s1539_s4 = smov [#allocation2 + $0x5]   ;;  %s143_s27 = int_to_ptr.vmem [resolvable:$true] %s1654_s27 }
  0x52   :  { %s1659_s28 = sshll.u32 %s1539_s4, 4  ;;  %s1661_s0 = sld [smem:[#allocation5 + $0x6]]  ;;  %s159_s28 = int_to_ptr.vmem [resolvable:$true] %s1659_s28 }
  0x53   :  { %s133_s29 = sshrl.u32 %s889_s22, 3  ;;  %s134_s30 = sand.u32 7, %s889_s22  }
  0x54   :  { %s135_s6 = smul.u32 48, %s133_s29  ;;  %s1664_s7 = sld [smem:[#allocation5 + $0x7]] }
  0x56   :  { %s136_s8 = sadd.s32 %s135_s6, %s134_s30  ;;  %s149_s9 = sshrl.u32 %s1656_s13, 3 }
  0x57   :  { %s137_s16 = scalar_lea.hbm %s1723_s1, %s136_s8  ;;  %s150_s19 = sand.u32 7, %s1656_s13  }
  0x58   :  { %s140_s11 = sshll.u32 %s137_s16, 4  ;;  %s151_s2 = smul.u32 48, %s149_s9  ;;  %s141_s11 = int_to_ptr.hbm [resolvable:$true] %s140_s11 }
  0x59   :  { %s165_s14 = sshrl.u32 %s1661_s0, 3  ;;  %s1382_s15 = sshra.s32 %s141_s11, 4  ;;  %s1383_s15 = int_to_ptr.hbm [resolvable:$true] %s1382_s15 }
  0x5a   :  { %s1384_s21 = scalar_lea.hbm %s1383_s15, 6  ;;  %p1387_p7 = scmp.lt.s32.totalorder %s1383_s15, %s1723_s1 }
  0x5b   :  { %p1385_p6 = scmp.ne.s32.totalorder %s1383_s15, %s1384_s21  ;;  %p1388_p8 = scmp.lt.s32.totalorder %s1609_s12, %s1384_s21 }
  0x5d   :  { %p1389_p9 = por %p1388_p8, %p1387_p7 }
  0x5f   :  { %p1390_p10 = pnand %p1389_p9, %p1385_p6 }
  0x61   :  { %1393 = shalt.err (!%p1390_p10)  }
  0x62   :  { %147 = dma.hbm_to_vmem [thread:$0]  %s141_s11, 96, %s143_s27, [#allocation3 + $0x4], %s1535_s17, %s1535_s17, %s1536_s20 }
  0x63   :  { %s152_s24 = sadd.s32 %s151_s2, %s150_s19  ;;  %s166_s25 = sand.u32 7, %s1661_s0  }
  0x64   :  { %s153_s13 = scalar_lea.hbm %s1723_s1, %s152_s24  ;;  %s167_s4 = smul.u32 48, %s165_s14 }
  0x65   :  { %s156_s29 = sshll.u32 %s153_s13, 4  ;;  %s1540_s30 = smov [#allocation2 + $0x6]   ;;  %s157_s29 = int_to_ptr.hbm [resolvable:$true] %s156_s29 }
  0x66   :  { %s1685_s6 = sshll.u32 %s1540_s30, 4  ;;  %s168_s8 = sadd.s32 %s167_s4, %s166_s25  ;;  %s175_s6 = int_to_ptr.vmem [resolvable:$true] %s1685_s6 }
  0x67   :  { %s1406_s9 = sshra.s32 %s157_s29, 4  ;;  %s1407_s9 = int_to_ptr.hbm [resolvable:$true] %s1406_s9 }
  0x68   :  { %s1408_s3 = scalar_lea.hbm %s1407_s9, 6  ;;  %p1411_p12 = scmp.lt.s32.totalorder %s1407_s9, %s1723_s1 }
  0x69   :  { %p1409_p11 = scmp.ne.s32.totalorder %s1407_s9, %s1408_s3  ;;  %p1412_p13 = scmp.lt.s32.totalorder %s1609_s12, %s1408_s3 }
  0x6b   :  { %p1413_p0 = por %p1412_p13, %p1411_p12 }
  0x6d   :  { %p1414_p1 = pnand %p1413_p0, %p1409_p11 }
  0x6f   :  { %1417 = shalt.err (!%p1414_p1)  }
  0x70   :  { %163 = dma.hbm_to_vmem [thread:$0]  %s157_s29, 96, %s159_s28, [#allocation3 + $0x5], %s1535_s17, %s1535_s17, %s1536_s20 }
  0x71   :  { %s169_s19 = scalar_lea.hbm %s1723_s1, %s168_s8  ;;  %s181_s2 = sshrl.u32 %s1664_s7, 3 }
  0x72   :  { %s172_s11 = sshll.u32 %s169_s19, 4  ;;  %s182_s14 = sand.u32 7, %s1664_s7   ;;  %s173_s11 = int_to_ptr.hbm [resolvable:$true] %s172_s11 }
  0x73   :  { %s1430_s15 = sshra.s32 %s173_s11, 4  ;;  %s1431_s15 = int_to_ptr.hbm [resolvable:$true] %s1430_s15 }
  0x74   :  { %s1432_s21 = scalar_lea.hbm %s1431_s15, 6  ;;  %p1435_p3 = scmp.lt.s32.totalorder %s1431_s15, %s1723_s1 }
  0x75   :  { %p1433_p2 = scmp.ne.s32.totalorder %s1431_s15, %s1432_s21  ;;  %p1436_p4 = scmp.lt.s32.totalorder %s1609_s12, %s1432_s21 }
  0x77   :  { %p1437_p5 = por %p1436_p4, %p1435_p3 }
  0x79   :  { %p1438_p6 = pnand %p1437_p5, %p1433_p2 }
  0x7b   :  { %1441 = shalt.err (!%p1438_p6)  }
  0x7c   :  { %179 = dma.hbm_to_vmem [thread:$0]  %s173_s11, 96, %s175_s6, [#allocation3 + $0x6], %s1535_s17, %s1535_s17, %s1536_s20 }
  0x7d   :  { %s183_s28 = smul.u32 48, %s181_s2  ;;  %s1541_s24 = smov [#allocation2 + $0x7]  }
  0x7e   :  { %s190_s7 = sshll.u32 %s1541_s24, 4  ;;  %s191_s7 = int_to_ptr.vmem [resolvable:$true] %s190_s7 }
  0x7f   :  { %s184_s25 = sadd.s32 %s183_s28, %s182_s14 }
  0x80   :  { %s185_s13 = scalar_lea.hbm %s1723_s1, %s184_s25 }
  0x81   :  { %s188_s4 = sshll.u32 %s185_s13, 4  ;;  %s189_s4 = int_to_ptr.hbm [resolvable:$true] %s188_s4 }
  0x82   :  { %s1454_s29 = sshra.s32 %s189_s4, 4  ;;  %s1455_s29 = int_to_ptr.hbm [resolvable:$true] %s1454_s29 }
  0x83   :  { %s1456_s30 = scalar_lea.hbm %s1455_s29, 6  ;;  %p1459_p8 = scmp.lt.s32.totalorder %s1455_s29, %s1723_s1 }
  0x84   :  { %p1457_p7 = scmp.ne.s32.totalorder %s1455_s29, %s1456_s30  ;;  %p1460_p9 = scmp.lt.s32.totalorder %s1609_s12, %s1456_s30 }
  0x86   :  { %p1461_p10 = por %p1460_p9, %p1459_p8 }
  0x88   :  { %p1462_p11 = pnand %p1461_p10, %p1457_p7 }
  0x8a   :  { %1465 = shalt.err (!%p1462_p11)  }
  0x8b   :  { %195 = dma.hbm_to_vmem [thread:$0]  %s189_s4, 96, %s191_s7, [#allocation3 + $0x7], %s1535_s17, %s1535_s17, %s1536_s20 }
  0x8c   :  { %1508 = dma.done.wait [#allocation3], 96 }
  0x8d   :  { %1509 = vsyncadd [#allocation3], 4294967200 }
  0x8e   :  { %1510 = dma.done.wait [#allocation3 + $0x1], 96 }
  0x8f   :  { %1511 = vsyncadd [#allocation3 + $0x1], 4294967200 }
  0x90   :  { %1512 = dma.done.wait [#allocation3 + $0x2], 96 }
  0x91   :  { %1513 = vsyncadd [#allocation3 + $0x2], 4294967200 }
  0x92   :  { %1514 = dma.done.wait [#allocation3 + $0x3], 96 }
  0x93   :  { %1515 = vsyncadd [#allocation3 + $0x3], 4294967200 }
  0x94   :  { %1516 = dma.done.wait [#allocation3 + $0x4], 96 }
  0x95   :  { %1517 = vsyncadd [#allocation3 + $0x4], 4294967200 }
  0x96   :  { %1518 = dma.done.wait [#allocation3 + $0x5], 96 }
  0x97   :  { %1519 = vsyncadd [#allocation3 + $0x5], 4294967200 }
  0x98   :  { %1520 = dma.done.wait [#allocation3 + $0x6], 96 }
  0x99   :  { %1521 = vsyncadd [#allocation3 + $0x6], 4294967200 }
  0x9a   :  { %1522 = dma.done.wait [#allocation3 + $0x7], 96 }
  0x9b   :  { %1523 = vsyncadd [#allocation3 + $0x7], 4294967200  ;;  %v1100_v0 = vld [vmem:[#allocation6 + $0x38] sm:$0xff]  ;;  %v1099_v2 = vld [vmem:[#allocation6 + $0x30] sm:$0xff]  ;;  %s1543_s1 = smov [#allocation12]   ;;  %s796_s6 = sshll.u32 %s1727_s5, 4  ;;  %s797_s6 = int_to_ptr.hbm [resolvable:$true] %s796_s6 }
  0x9c   :  { %v1108_v1 = vld [vmem:[#allocation6 + $0x78] sm:$0xff]  ;;  %610 = vmatpush.bf16.msra.mxu0 %v1100_v0  ;;  %v1107_v3 = vld [vmem:[#allocation6 + $0x70] sm:$0xff]  ;;  %v1098_v8 = vld [vmem:[#allocation6 + $0x28] sm:$0xff]  ;;  %s794_s12 = sshll.u32 %s1543_s1, 4  ;;  %s795_s12 = int_to_ptr.vmem [resolvable:$true] %s794_s12 }
  0x9d   :  { %623 = vmatpush.bf16.msra.mxu1 %v1108_v1  ;;  %v1116_v4 = vld [vmem:[#allocation6 + $0xb8] sm:$0xff]  ;;  %v1115_v6 = vld [vmem:[#allocation6 + $0xb0] sm:$0xff]  ;;  %v1106_v9 = vld [vmem:[#allocation6 + $0x68] sm:$0xff] }
  0x9e   :  { %v1124_v5 = vld [vmem:[#allocation6 + $0xf8] sm:$0xff]  ;;  %636 = vmatpush.bf16.msra.mxu2 %v1116_v4  ;;  %v1123_v7 = vld [vmem:[#allocation6 + $0xf0] sm:$0xff]  ;;  %v1114_v10 = vld [vmem:[#allocation6 + $0xa8] sm:$0xff] }
  0x9f   :  { %649 = vmatpush.bf16.msra.mxu3 %v1124_v5  ;;  %v1122_v11 = vld [vmem:[#allocation6 + $0xe8] sm:$0xff]  ;;  %v1097_v12 = vld [vmem:[#allocation6 + $0x20] sm:$0xff]  ;;  %v1096_v16 = vld [vmem:[#allocation6 + $0x18] sm:$0xff] }
  0xa0   :  { %611 = vmatpush.bf16.msra.mxu0 %v1099_v2  ;;  %v1105_v13 = vld [vmem:[#allocation6 + $0x60] sm:$0xff]  ;;  %v1104_v17 = vld [vmem:[#allocation6 + $0x58] sm:$0xff]  ;;  %v1095_v20 = vld [vmem:[#allocation6 + $0x10] sm:$0xff] }
  0xa1   :  { %624 = vmatpush.bf16.msra.mxu1 %v1107_v3  ;;  %v1113_v14 = vld [vmem:[#allocation6 + $0xa0] sm:$0xff]  ;;  %v1112_v18 = vld [vmem:[#allocation6 + $0x98] sm:$0xff]  ;;  %v1103_v21 = vld [vmem:[#allocation6 + $0x50] sm:$0xff] }
  0xa2   :  { %637 = vmatpush.bf16.msra.mxu2 %v1115_v6  ;;  %v1121_v15 = vld [vmem:[#allocation6 + $0xe0] sm:$0xff]  ;;  %v1120_v19 = vld [vmem:[#allocation6 + $0xd8] sm:$0xff]  ;;  %v1111_v22 = vld [vmem:[#allocation6 + $0x90] sm:$0xff] }
  0xa3   :  { %650 = vmatpush.bf16.msra.mxu3 %v1123_v7  ;;  %v1119_v23 = vld [vmem:[#allocation6 + $0xd0] sm:$0xff]  ;;  %v1094_v24 = vld [vmem:[#allocation6 + $0x8] sm:$0xff]  ;;  %v1093_v28 = vld [vmem:[#allocation6] sm:$0xff] }
  0xa4   :  { %612 = vmatpush.bf16.msra.mxu0 %v1098_v8  ;;  %v1102_v25 = vld [vmem:[#allocation6 + $0x48] sm:$0xff]  ;;  %v1101_v29 = vld [vmem:[#allocation6 + $0x40] sm:$0xff]  ;;  %v213_v30 = vld [vmem:[#allocation2] sm:$0xff] }
  0xa5   :  { %625 = vmatpush.bf16.msra.mxu1 %v1106_v9  ;;  %v1110_v26 = vld [vmem:[#allocation6 + $0x88] sm:$0xff]  ;;  %v214_v31 = vld [vmem:[#allocation2 + $0x8] sm:$0xff]  ;;  %v1109_v34 = vld [vmem:[#allocation6 + $0x80] sm:$0xff]  ;;  %v220_v36 = vpack.c.bf16 %v213_v30, %v213_v30 }
  0xa6   :  { %638 = vmatpush.bf16.msra.mxu2 %v1114_v10  ;;  %v1118_v27 = vld [vmem:[#allocation6 + $0xc8] sm:$0xff]  ;;  %v1132_v32 = vld [vmem:[#allocation6 + $0x138] sm:$0xff]  ;;  %v1117_v35 = vld [vmem:[#allocation6 + $0xc0] sm:$0xff]  ;;  %v221_v37 = vpack.c.bf16 %v214_v31, %v214_v31  ;;  %v1542_v10 = vmov 8.0  }
  0xa7   :  { %651 = vmatpush.bf16.msra.mxu3 %v1122_v11  ;;  %v1140_v33 = vld [vmem:[#allocation6 + $0x178] sm:$0xff]  ;;  %v215_v38 = vld [vmem:[#allocation2 + $0x10] sm:$0xff]  ;;  %v216_v39 = vld [vmem:[#allocation2 + $0x18] sm:$0xff]  ;;  %1198 = vrcp.f32 %v1542_v10 }
  0xa8   :  { %613 = vmatpush.bf16.msra.mxu0 %v1097_v12  ;;  %v1131_v40 = vld [vmem:[#allocation6 + $0x130] sm:$0xff]  ;;  %v222_v42 = vpack.c.bf16 %v215_v38, %v215_v38  ;;  %v223_v43 = vpack.c.bf16 %v216_v39, %v216_v39  ;;  %v1130_v44 = vld [vmem:[#allocation6 + $0x128] sm:$0xff]  ;;  %v1129_v46 = vld [vmem:[#allocation6 + $0x120] sm:$0xff] }
  0xa9   :  { %626 = vmatpush.bf16.msra.mxu1 %v1105_v13  ;;  %v1139_v41 = vld [vmem:[#allocation6 + $0x170] sm:$0xff]  ;;  %v1138_v45 = vld [vmem:[#allocation6 + $0x168] sm:$0xff]  ;;  %v1137_v47 = vld [vmem:[#allocation6 + $0x160] sm:$0xff] }
  0xaa   :  { %639 = vmatpush.bf16.msra.mxu2 %v1113_v14  ;;  %v1128_v48 = vld [vmem:[#allocation6 + $0x118] sm:$0xff]  ;;  %v1127_v50 = vld [vmem:[#allocation6 + $0x110] sm:$0xff]  ;;  %v1126_v52 = vld [vmem:[#allocation6 + $0x108] sm:$0xff] }
  0xab   :  { %652 = vmatpush.bf16.msra.mxu3 %v1121_v15  ;;  %v1136_v49 = vld [vmem:[#allocation6 + $0x158] sm:$0xff]  ;;  %v1135_v51 = vld [vmem:[#allocation6 + $0x150] sm:$0xff]  ;;  %v1134_v53 = vld [vmem:[#allocation6 + $0x148] sm:$0xff] }
  0xac   :  { %614 = vmatpush.bf16.msra.mxu0 %v1096_v16  ;;  %v1125_v54 = vld [vmem:[#allocation6 + $0x100] sm:$0xff]  ;;  %v217_v56 = vld [vmem:[#allocation2 + $0x20] sm:$0xff]  ;;  %v218_v57 = vld [vmem:[#allocation2 + $0x28] sm:$0xff] }
  0xad   :  { %627 = vmatpush.bf16.msra.mxu1 %v1104_v17  ;;  %v1133_v55 = vld [vmem:[#allocation6 + $0x140] sm:$0xff]  ;;  %v224_v58 = vpack.c.bf16 %v217_v56, %v217_v56  ;;  %v225_v59 = vpack.c.bf16 %v218_v57, %v218_v57  ;;  %v1178_v3 = vld [vmem:[#allocation11 + $0x30] sm:$0xff]   ;;  %v1177_v9 = vld [vmem:[#allocation11 + $0x28] sm:$0xff]   ;;  %v1199_v16 = vpop.eup %1198 }
  0xae   :  { %640 = vmatpush.bf16.msra.mxu2 %v1112_v18  ;;  %v1179_v2 = vld [vmem:[#allocation11 + $0x38] sm:$0xff]   ;;  %v1168_v8 = vunpack.c.h.bf16 %v1178_v3  ;;  %v1167_v11 = vunpack.c.l.bf16 %v1178_v3  ;;  %v1164_v13 = vunpack.c.h.bf16 %v1177_v9  ;;  %v1176_v14 = vld [vmem:[#allocation11 + $0x20] sm:$0xff]   ;;  %v1163_v15 = vunpack.c.l.bf16 %v1177_v9 }
  0xaf   :  { %653 = vmatpush.bf16.msra.mxu3 %v1120_v19  ;;  %v1172_v4 = vunpack.c.h.bf16 %v1179_v2  ;;  %v1171_v5 = vunpack.c.l.bf16 %v1179_v2  ;;  %v1160_v18 = vunpack.c.h.bf16 %v1176_v14  ;;  %v1175_v19 = vld [vmem:[#allocation11 + $0x18] sm:$0xff]   ;;  %vm699_vm0 = vweird.f32 %v1199_v16 }
  0xb0   :  { %615 = vmatpush.bf16.msra.mxu0 %v1095_v20  ;;  %v1159_v20 = vunpack.c.l.bf16 %v1176_v14 }
  0xb1   :  { %628 = vmatpush.bf16.msra.mxu1 %v1103_v21  ;;  %v695_v21 = vmul.f32 8.0, %v1199_v16 }
  0xb2   :  { %641 = vmatpush.bf16.msra.mxu2 %v1111_v22 }
  0xb3   :  { %654 = vmatpush.bf16.msra.mxu3 %v1119_v23 }
  0xb4   :  { %616 = vmatpush.bf16.msra.mxu0 %v1094_v24 }
  0xb5   :  { %629 = vmatpush.bf16.msra.mxu1 %v1102_v25  ;;  %v1156_v25 = vunpack.c.h.bf16 %v1175_v19 }
  0xb6   :  { %642 = vmatpush.bf16.msra.mxu2 %v1110_v26 }
  0xb7   :  { %655 = vmatpush.bf16.msra.mxu3 %v1118_v27  ;;  %v1174_v27 = vld [vmem:[#allocation11 + $0x10] sm:$0xff]  }
  0xb8   :  { %617 = vmatpush.bf16.msra.mxu0 %v1093_v28  ;;  %v1155_v28 = vunpack.c.l.bf16 %v1175_v19  ;;  %v1152_v31 = vunpack.c.h.bf16 %v1174_v27 }
  0xb9   :  { %630 = vmatpush.bf16.msra.mxu1 %v1101_v29  ;;  %v696_v29 = vsub.f32 1.0, %v695_v21 }
  0xba   :  { %643 = vmatpush.bf16.msra.mxu2 %v1109_v34  ;;  %v1173_v34 = vld [vmem:[#allocation11 + $0x8] sm:$0xff]  }
  0xbb   :  { %656 = vmatpush.bf16.msra.mxu3 %v1117_v35  ;;  %618 = vmatmul.bf16.vlgmr.msra.gmra.mxu0 %v220_v36  ;;  %v1151_v35 = vunpack.c.l.bf16 %v1174_v27  ;;  %v697_v36 = vmul.f32 %v1199_v16, %v696_v29 }
  0xbc   :  { %662 = vmatpush.bf16.msrb.mxu0 %v1132_v32  ;;  %631 = vmatmul.bf16.vlgmr.msra.gmra.mxu1 %v221_v37 }
  0xbd   :  { %675 = vmatpush.bf16.msrb.mxu1 %v1140_v33  ;;  %644 = vmatmul.bf16.vlgmr.msra.gmra.mxu2 %v222_v42 }
  0xbe   :  { %657 = vmatmul.bf16.vlgmr.msra.gmra.mxu3 %v223_v43  ;;  %768 = vmatpush.msrb.mxu2 %v1172_v4  ;;  %v219_v4 = vld [vmem:[#allocation9] sm:$0x7] }
  0xc0   :  { %663 = vmatpush.bf16.msrb.mxu0 %v1131_v40  ;;  %769 = vmatpush.msrb.mxu2 %v1171_v5 }
  0xc1   :  { %676 = vmatpush.bf16.msrb.mxu1 %v1139_v41  ;;  %v1148_v41 = vunpack.c.h.bf16 %v1173_v34 }
  0xc2   :  { %770 = vmatpush.msrb.mxu2 %v1168_v8 }
  0xc4   :  { %664 = vmatpush.bf16.msrb.mxu0 %v1130_v44  ;;  %771 = vmatpush.msrb.mxu2 %v1167_v11  ;;  %v1142_v44 = vld [vmem:[#allocation11] sm:$0xff]  }
  0xc5   :  { %677 = vmatpush.bf16.msrb.mxu1 %v1138_v45  ;;  %v1147_v45 = vunpack.c.l.bf16 %v1173_v34 }
  0xc6   :  { %772 = vmatpush.msrb.mxu2 %v1164_v13 }
  0xc8   :  { %665 = vmatpush.bf16.msrb.mxu0 %v1129_v46  ;;  %773 = vmatpush.msrb.mxu2 %v1163_v15  ;;  %v698_v46 = vadd.f32 %v1199_v16, %v697_v36 }
  0xc9   :  { %678 = vmatpush.bf16.msrb.mxu1 %v1137_v47 }
  0xca   :  { %774 = vmatpush.msrb.mxu2 %v1160_v18 }
  0xcc   :  { %666 = vmatpush.bf16.msrb.mxu0 %v1128_v48  ;;  %775 = vmatpush.msrb.mxu2 %v1159_v20 }
  0xcd   :  { %679 = vmatpush.bf16.msrb.mxu1 %v1136_v49  ;;  %v1144_v49 = vunpack.c.h.bf16 %v1142_v44 }
  0xce   :  { %776 = vmatpush.msrb.mxu2 %v1156_v25 }
  0xd0   :  { %667 = vmatpush.bf16.msrb.mxu0 %v1127_v50  ;;  %777 = vmatpush.msrb.mxu2 %v1155_v28 }
  0xd1   :  { %680 = vmatpush.bf16.msrb.mxu1 %v1135_v51 }
  0xd2   :  { %778 = vmatpush.msrb.mxu2 %v1152_v31 }
  0xd4   :  { %668 = vmatpush.bf16.msrb.mxu0 %v1126_v52  ;;  %779 = vmatpush.msrb.mxu2 %v1151_v35  ;;  %v1143_v52 = vunpack.c.l.bf16 %v1142_v44 }
  0xd5   :  { %681 = vmatpush.bf16.msrb.mxu1 %v1134_v53  ;;  %v700_v53 = vsel %vm699_vm0, %v1199_v16, %v698_v46  ;;  %v767_v16 = vperm.slane %v219_v4, 2 }
  0xd6   :  { %780 = vmatpush.msrb.mxu2 %v1148_v41 }
  0xd8   :  { %669 = vmatpush.bf16.msrb.mxu0 %v1125_v54  ;;  %781 = vmatpush.msrb.mxu2 %v1147_v45 }
  0xd9   :  { %682 = vmatpush.bf16.msrb.mxu1 %v1133_v55 }
  0xda   :  { %782 = vmatpush.msrb.mxu2 %v1144_v49 }
  0xdb   :  { %670 = vmatmul.bf16.vlgmr.msrb.gmra.mxu0 %v224_v58 }
  0xdc   :  { %683 = vmatmul.bf16.vlgmr.msrb.gmra.mxu1 %v225_v59  ;;  %783 = vmatpush.msrb.mxu2 %v1143_v52 }
 0x138   :  { %v619_v60 = vpop.f32.mrf.mxu0 }
 0x139   :  { %v632_v61 = vpop.f32.mrf.mxu1 }
 0x13a   :  { %v633_v12 = vadd.f32 %v632_v61, %v619_v60 }
 0x140   :  { %v621_v62 = vpop.f32.mrf.mxu0  ;;  %v645_v0 = vpop.f32.mrf.mxu2 }
 0x141   :  { %v634_v63 = vpop.f32.mrf.mxu1  ;;  %v658_v1 = vpop.f32.mrf.mxu3  ;;  %v646_v17 = vadd.f32 %v645_v0, %v633_v12 }
 0x143   :  { %v659_v22 = vadd.f32 %v658_v1, %v646_v17 }
 0x148   :  { %v647_v6 = vpop.f32.mrf.mxu2 }
 0x149   :  { %v660_v7 = vpop.f32.mrf.mxu3 }
 0x158   :  { %v671_v23 = vpop.f32.mrf.mxu0 }
 0x159   :  { %v684_v24 = vpop.f32.mrf.mxu1  ;;  %v672_v26 = vadd.f32 %v671_v23, %v659_v22 }
 0x15b   :  { %v685_v30 = vadd.f32 %v684_v24, %v672_v26 }
 0x15d   :  { %v688_v32 = vrot.slane %v685_v30, 4  ;;  %v702_v33 = vmul.f32 %v685_v30, %v685_v30 }
 0x15f   :  { %v689_v37 = vadd.f32 %v688_v32, %v685_v30  ;;  %v703_v38 = vrot.slane %v702_v33, 4 }
 0x160   :  { %v673_v39 = vpop.f32.mrf.mxu0 }
 0x161   :  { %v686_v40 = vpop.f32.mrf.mxu1  ;;  %v690_v42 = vrot.slane %v689_v37, 2  ;;  %v704_v43 = vadd.f32 %v703_v38, %v702_v33 }
 0x163   :  { %v691_v47 = vadd.f32 %v690_v42, %v689_v37  ;;  %v705_v48 = vrot.slane %v704_v43, 2 }
 0x165   :  { %v692_v50 = vrot.slane %v691_v47, 1  ;;  %v706_v51 = vadd.f32 %v705_v48, %v704_v43 }
 0x167   :  { %v693_v54 = vadd.f32 %v692_v50, %v691_v47  ;;  %v707_v55 = vrot.slane %v706_v51, 1 }
 0x169   :  { %v708_v56 = vadd.f32 %v707_v55, %v706_v51  ;;  %v701_v57 = vmul.f32 %v700_v53, %v693_v54 }
 0x16b   :  { %v709_v58 = vmul.f32 %v708_v56, %v700_v53  ;;  %v710_v59 = vmul.f32 %v701_v57, %v701_v57 }
 0x16d   :  { %v711_v60 = vsub.f32 %v709_v58, %v710_v59 }
 0x16f   :  { %v712_v61 = vmax.f32 %v711_v60, 0.0 }
 0x171   :  { %v713_v62 = vadd.f32 1e-05, %v712_v61 }
 0x173   :  { %1200 = vrsqrt.f32 %v713_v62  ;;  %vm720_vm2 = vweird.f32 %v713_v62 }
 0x179   :  { %v1201_v63 = vpop.eup %1200 }
 0x17a   :  { %v715_v0 = vmul.f32 %v1201_v63, %v713_v62  ;;  %vm721_vm1 = vweird.f32 %v1201_v63 }
 0x17b   :  { %vm722_vm3 = vmor %vm720_vm2, %vm721_vm1 }
 0x17c   :  { %v716_v1 = vmul.f32 %v1201_v63, %v715_v0 }
 0x17e   :  { %v717_v2 = vmul.f32 0.5, %v716_v1 }
 0x180   :  { %v718_v3 = vsub.f32 1.5, %v717_v2 }
 0x182   :  { %v719_v5 = vmul.f32 %v1201_v63, %v718_v3 }
 0x184   :  { %v723_v6 = vsel %vm722_vm3, %v1201_v63, %v719_v5 }
 0x185   :  { %v724_v7 = vmul.f32 %v723_v6, %v219_v4 }
 0x187   :  { %v725_v8 = vmul.f32 %v724_v7, %v701_v57  ;;  %v730_v10 = vperm.slane %v724_v7, 0 }
 0x189   :  { %v727_v9 = vrot.slane %v725_v8, 7  ;;  %v731_v12 = vmul.f32 %v730_v10, %v685_v30 }
 0x18b   :  { %v729_v11 = vsub.f32 %v219_v4, %v727_v9 }
 0x18d   :  { %v732_v13 = vperm.slane %v729_v11, 1 }
 0x18f   :  { %v733_v14 = vadd.f32 %v732_v13, %v731_v12 }
 0x191   :  { %v734_v15 = vmax.f32 %v733_v14, 0.0 }
 0x193   :  { %784 = vmatmul.f32.vlgmr.msrb.gmra.mxu2 %v734_v15 }
 0x216   :  { %v785_v17 = vpop.f32.mrf.mxu2 }
 0x217   :  { %v786_v18 = vadd.f32 %v785_v17, %v767_v16 }
 0x219   :  { %788 = vst [vmem:[#allocation12] sm:$0xff] %v786_v18 }
 0x21a   :  { %799 = dma.vmem_to_hbm [thread:$0]  %s795_s12, 128, %s797_s6, [#allocation8]  }
 0x21b   :  { %1524 = dma.done.wait [#allocation8], 128  }
 0x21c   :  { %1525 = vsyncadd [#allocation8], 4294967168 }
 0x21d   :  { %804 = vsyncpa [#allocation7], 1 }
 0x21e   :  { %805 = vsyncpa [#allocation10], 1 }
 0x21f   :  { %806 = vsyncpa [#allocation8], 1 }
 0x220   :  { %807 = vsyncmov [#allocation3] }
 0x223   :  { %s808_s3 = vpop.sfrf %807 }
 0x224   :  { %p1085_p12 = scmp.ne.s32.totalorder %s808_s3, 0 }
 0x226   :  { %812 = shalt.err (%p1085_p12)  }
 0x227   :  { %814 = vsyncmov [#allocation3 + $0x1] }
 0x22a   :  { %s815_s10 = vpop.sfrf %814 }
 0x22b   :  { %p1086_p13 = scmp.ne.s32.totalorder %s815_s10, 0 }
 0x22d   :  { %819 = shalt.err (%p1086_p13)  }
 0x22e   :  { %821 = vsyncmov [#allocation3 + $0x2] }
 0x231   :  { %s822_s5 = vpop.sfrf %821 }
 0x232   :  { %p1087_p0 = scmp.ne.s32.totalorder %s822_s5, 0 }
 0x234   :  { %826 = shalt.err (%p1087_p0)  }
 0x235   :  { %828 = vsyncmov [#allocation3 + $0x3] }
 0x238   :  { %s829_s16 = vpop.sfrf %828 }
 0x239   :  { %p1088_p1 = scmp.ne.s32.totalorder %s829_s16, 0 }
 0x23b   :  { %833 = shalt.err (%p1088_p1)  }
 0x23c   :  { %835 = vsyncmov [#allocation3 + $0x4] }
 0x23f   :  { %s836_s27 = vpop.sfrf %835 }
 0x240   :  { %p1089_p2 = scmp.ne.s32.totalorder %s836_s27, 0 }
 0x242   :  { %840 = shalt.err (%p1089_p2)  }
 0x243   :  { %842 = vsyncmov [#allocation3 + $0x5] }
 0x246   :  { %s843_s0 = vpop.sfrf %842 }
 0x247   :  { %p1090_p3 = scmp.ne.s32.totalorder %s843_s0, 0 }
 0x249   :  { %847 = shalt.err (%p1090_p3)  }
 0x24a   :  { %849 = vsyncmov [#allocation3 + $0x6] }
 0x24d   :  { %s850_s19 = vpop.sfrf %849 }
 0x24e   :  { %p1091_p4 = scmp.ne.s32.totalorder %s850_s19, 0 }
 0x250   :  { %854 = shalt.err (%p1091_p4)  }
 0x251   :  { %856 = vsyncmov [#allocation3 + $0x7] }
 0x254   :  { %s857_s11 = vpop.sfrf %856 }
 0x255   :  { %p1092_p5 = scmp.ne.s32.totalorder %s857_s11, 0 }
 0x257   :  { %861 = shalt.err (%p1092_p5)  }

</bundles_post_ra>
